<compile_context>
chip_gen: v5e
topology: v5e:2x2
jax: 0.10.0
libtpu: 0.0.40
codegen_flags: <defaults>
</compile_context>

<pallas_src>
import functools

import jax
import jax.numpy as jnp
import numpy as np
from jax import lax
from jax.experimental import pallas as pl
from jax.experimental.pallas import tpu as pltpu

_EPS_NORM = 1e-12
_LANE = 128
_SUBLANE = 8


def _round_up(x, m):
    return ((x + m - 1) // m) * m


def _pad2d(x, rows, cols):
    r, c = x.shape
    if r == rows and c == cols:
        return x
    return jnp.pad(x, ((0, rows - r), (0, cols - c)))


def _l2_normalize(x):
    ss = jnp.sum(x * x, axis=-1, keepdims=True)
    return x / jnp.maximum(jnp.sqrt(ss), _EPS_NORM)


# ----------------------------------------------------------------------------
# Alignment:  mean_rows || normalize(u) - normalize(i) ||^2
# ----------------------------------------------------------------------------
def _alignment_kernel(u_ref, i_ref, out_ref):
    u = _l2_normalize(u_ref[...].astype(jnp.float32))
    v = _l2_normalize(i_ref[...].astype(jnp.float32))
    d = u - v
    # Zero-padded rows normalize to zero and contribute nothing.
    # Lane-dense (1, Dp) partial; final (tiny) reduce happens in the wrapper.
    out_ref[...] = jnp.sum(d * d, axis=0, keepdims=True)


def _alignment_sum(user_vecs, item_vecs):
    n, d = user_vecs.shape
    dp = _round_up(max(d, _LANE), _LANE)
    row_tile = min(512, _round_up(n, _SUBLANE))      # big tiles -> HBM roofline
    rows = _round_up(n, row_tile)
    u = _pad2d(user_vecs.astype(jnp.float32), rows, dp)
    v = _pad2d(item_vecs.astype(jnp.float32), rows, dp)
    nb = rows // row_tile

    partials = pl.pallas_call(
        _alignment_kernel,
        out_shape=jax.ShapeDtypeStruct((nb, dp), jnp.float32),
        grid_spec=pltpu.PrefetchScalarGridSpec(
            num_scalar_prefetch=0,
            grid=(nb,),
            in_specs=[
                pl.BlockSpec((row_tile, dp), lambda r: (r, 0)),
                pl.BlockSpec((row_tile, dp), lambda r: (r, 0)),
            ],
            out_specs=pl.BlockSpec((1, dp), lambda r: (r, 0)),
        ),
        compiler_params=pltpu.CompilerParams(
            dimension_semantics=("parallel",)),
    )(u, v)
    return jnp.sum(partials)


def alignment_loss(user_vecs, item_vecs):
    n = user_vecs.shape[0]
    return _alignment_sum(user_vecs, item_vecs) / jnp.float32(n)


# ----------------------------------------------------------------------------
# Uniformity:  log( mean_{i<j} exp(-t * ||xn_i - xn_j||^2) + 1e-8 )
# For unit rows:  ||xn_i - xn_j||^2 = 2 - 2 g_ij  =>  exp(-t d^2) = exp(2t(g-1))
# ----------------------------------------------------------------------------
def _uniformity_kernel(n_ref, xi_ref, xj_ref, out_ref, *, t, tm, tn):
    bi = pl.program_id(0)
    bj = pl.program_id(1)

    @pl.when(bj == 0)
    def _init():
        out_ref[...] = jnp.zeros_like(out_ref)

    @pl.when(bj >= bi)             # upper-triangle blocks only (gram symmetry)
    def _compute():
        n = n_ref[0]
        xi = _l2_normalize(xi_ref[...].astype(jnp.float32))
        xj = _l2_normalize(xj_ref[...].astype(jnp.float32))
        # Gram block: contract the lane-resident last axis of both row-major
        # tiles on the MXU (no transposed RHS tile materialized).
        g = lax.dot_general(xi, xj, (((1,), (1,)), ((), ())),
                            preferred_element_type=jnp.float32)  # (tm, tn)
        e = jnp.exp((2.0 * t) * (g - 1.0))
        rows = bi * tm + lax.broadcasted_iota(jnp.int32, (tm, tn), 0)
        cols = bj * tn + lax.broadcasted_iota(jnp.int32, (tm, tn), 1)
        valid = (rows < n) & (cols < n) & (rows != cols)
        e = jnp.where(valid, e, 0.0)
        # Off-diagonal blocks carry each unordered pair once -> weight 2;
        # diagonal blocks already contain both orderings -> weight 1.
        w = jnp.where(bj > bi, 2.0, 1.0).astype(jnp.float32)
        # Lane-dense (1, tn) partial accumulated in the resident output block.
        out_ref[...] += w * jnp.sum(e, axis=0, keepdims=True)


def _uniformity_ordered_pair_sum(x, t, *, tile=128):
    # TODO(synk): on v6e/v7x a 256-wide bf16 gram tile would better feed the
    # 2x256x256 MXU; 128 f32 tiles are kept as the universally safe choice.
    n, d = x.shape
    dp = _round_up(max(d, _LANE), _LANE)
    rows = _round_up(max(n, tile), tile)
    xp = _pad2d(x.astype(jnp.float32), rows, dp)
    nb = rows // tile
    n_arr = jnp.array([n], dtype=jnp.int32)

    kernel = functools.partial(_uniformity_kernel, t=float(t), tm=tile, tn=tile)
    partials = pl.pallas_call(
        kernel,
        out_shape=jax.ShapeDtypeStruct((nb, tile), jnp.float32),
        grid_spec=pltpu.PrefetchScalarGridSpec(
            num_scalar_prefetch=1,
            grid=(nb, nb),                       # j (reduction) axis last
            in_specs=[
                pl.BlockSpec((tile, dp), lambda i, j, n_s: (i, 0)),
                pl.BlockSpec((tile, dp), lambda i, j, n_s: (j, 0)),
            ],
            out_specs=pl.BlockSpec((1, tile), lambda i, j, n_s: (i, 0)),
        ),
        compiler_params=pltpu.CompilerParams(
            dimension_semantics=("parallel", "arbitrary")),
    )(n_arr, xp, xp)
    return jnp.sum(partials)        # == 2 * sum over unordered pairs (i < j)


def uniformity_loss(x, t=2.0):
    n = x.shape[0]
    ordered_sum = _uniformity_ordered_pair_sum(x, t)
    mean = ordered_sum / jnp.float32(n * (n - 1))   # = pdist_sum / (n(n-1)/2)
    return jnp.log(mean + 1e-8)


# ----------------------------------------------------------------------------
# Model
# ----------------------------------------------------------------------------
def _xavier_uniform(key, shape):
    fan_out, fan_in = shape
    bound = float(np.sqrt(6.0 / (fan_in + fan_out)))
    return jax.random.uniform(key, shape, jnp.float32, -bound, bound)


class DirectAU:
    def __init__(self, num_users, num_items, embedding_size=64, gamma=1.0,
                 key=None):
        if key is None:
            key = jax.random.PRNGKey(0)
        ku, ki = jax.random.split(key)
        self.user_embedding = _xavier_uniform(ku, (num_users, embedding_size))
        self.item_embedding = _xavier_uniform(ki, (num_items, embedding_size))
        self.gamma = float(gamma)

    def forward(self):
        # No Pallas copy kernel: returning the weights directly is semantically
        # identical and avoids a full HBM read+write of both tables.
        return self.user_embedding, self.item_embedding

    def calculate_loss(self, user_vecs, item_vecs):
        align = alignment_loss(user_vecs, item_vecs)
        uniform = self.gamma * (uniformity_loss(user_vecs) +
                                uniformity_loss(item_vecs)) / 2.0
        return align + uniform


# ----------------------------------------------------------------------------
# Pure-JAX reference (torch semantics) for a sanity check.
# ----------------------------------------------------------------------------
def _reference_loss(user_vecs, item_vecs, gamma=1.0, t=2.0):
    def norm(x):
        return x / jnp.maximum(
            jnp.linalg.norm(x, axis=-1, keepdims=True), _EPS_NORM)

    def align(u, i):
        u, i = norm(u), norm(i)
        return jnp.mean(jnp.sum((u - i) ** 2, axis=1))

    def uniform(x):
        xn = norm(x)
        n = xn.shape[0]
        diff = xn[:, None, :] - xn[None, :, :]
        sq = jnp.sum(diff * diff, axis=-1)
        iu, ju = jnp.triu_indices(n, k=1)
        vals = jnp.exp(-t * sq[iu, ju])
        return jnp.log(jnp.mean(vals) + 1e-8)

    return (align(user_vecs, item_vecs) +
            gamma * (uniform(user_vecs) + uniform(item_vecs)) / 2.0)


if __name__ == "__main__":
    key = jax.random.PRNGKey(0)
    k_model, k_users, k_items = jax.random.split(key, 3)

    num_users, num_items, emb, batch = 32, 48, 64, 16
    model = DirectAU(num_users, num_items, embedding_size=emb, gamma=1.0,
                     key=k_model)

    user_w, item_w = model.forward()
    jax.block_until_ready((user_w, item_w))

    user_ids = jax.random.randint(k_users, (batch,), 0, num_users)
    item_ids = jax.random.randint(k_items, (batch,), 0, num_items)
    user_vecs = user_w[user_ids]
    item_vecs = item_w[item_ids]

    loss = model.calculate_loss(user_vecs, item_vecs)
    loss = jax.block_until_ready(loss)

    ref = jax.block_until_ready(
        _reference_loss(user_vecs, item_vecs, gamma=model.gamma))

    if not np.isfinite(float(loss)):
        raise RuntimeError(f"non-finite loss: {loss}")
    np.testing.assert_allclose(float(loss), float(ref), rtol=5e-2, atol=5e-2)
    print("KERNEL_OK")
</pallas_src>

<mosaic_0001>
module attributes {stable_mosaic.version = 11 : i64} {
  func.func @_alignment_kernel(%arg0: i32, %arg1: memref<16x128xf32, #tpu.memory_space<vmem>>, %arg2: memref<16x128xf32, #tpu.memory_space<vmem>>, %arg3: memref<1x128xf32, #tpu.memory_space<vmem>>) attributes {dimension_semantics = [#tpu.dimension_semantics<parallel>], iteration_bounds = array<i64: 1>, scalar_prefetch = 0 : i64, scratch_operands = 0 : i64, tpu.core_type = #tpu.core_type<tc>, window_params = [{transform_indices = @transform_0, window_bounds = array<i64: 16, 128>}, {transform_indices = @transform_1, window_bounds = array<i64: 16, 128>}, {transform_indices = @transform_2, window_bounds = array<i64: 1, 128>}]} {
    %c0 = arith.constant 0 : index
    %c0_0 = arith.constant 0 : index
    %0 = vector.load %arg1[%c0, %c0_0] : memref<16x128xf32, #tpu.memory_space<vmem>>, vector<16x128xf32>
    %1 = arith.mulf %0, %0 : vector<16x128xf32>
    %cst = arith.constant dense<0.000000e+00> : vector<16xf32>
    %2 = vector.multi_reduction <add>, %1, %cst [1] : vector<16x128xf32> to vector<16xf32>
    %3 = vector.shape_cast %2 : vector<16xf32> to vector<16x1xf32>
    %4 = math.sqrt %3 : vector<16x1xf32>
    %cst_1 = arith.constant 9.99999996E-13 : f32
    %5 = vector.broadcast %cst_1 : f32 to vector<16x1xf32>
    %6 = arith.maximumf %4, %5 : vector<16x1xf32>
    %7 = vector.broadcast %6 : vector<16x1xf32> to vector<16x128xf32>
    %8 = arith.divf %0, %7 : vector<16x128xf32>
    %c0_2 = arith.constant 0 : index
    %c0_3 = arith.constant 0 : index
    %9 = vector.load %arg2[%c0_2, %c0_3] : memref<16x128xf32, #tpu.memory_space<vmem>>, vector<16x128xf32>
    %10 = arith.mulf %9, %9 : vector<16x128xf32>
    %cst_4 = arith.constant dense<0.000000e+00> : vector<16xf32>
    %11 = vector.multi_reduction <add>, %10, %cst_4 [1] : vector<16x128xf32> to vector<16xf32>
    %12 = vector.shape_cast %11 : vector<16xf32> to vector<16x1xf32>
    %13 = math.sqrt %12 : vector<16x1xf32>
    %cst_5 = arith.constant 9.99999996E-13 : f32
    %14 = vector.broadcast %cst_5 : f32 to vector<16x1xf32>
    %15 = arith.maximumf %13, %14 : vector<16x1xf32>
    %16 = vector.broadcast %15 : vector<16x1xf32> to vector<16x128xf32>
    %17 = arith.divf %9, %16 : vector<16x128xf32>
    %18 = arith.subf %8, %17 : vector<16x128xf32>
    %19 = arith.mulf %18, %18 : vector<16x128xf32>
    %cst_6 = arith.constant dense<0.000000e+00> : vector<128xf32>
    %20 = vector.multi_reduction <add>, %19, %cst_6 [0] : vector<16x128xf32> to vector<128xf32>
    %21 = vector.shape_cast %20 : vector<128xf32> to vector<1x128xf32>
    %c0_7 = arith.constant 0 : index
    %c0_8 = arith.constant 0 : index
    %22 = vector.load %arg3[%c0_7, %c0_8] : memref<1x128xf32, #tpu.memory_space<vmem>>, vector<1x128xf32>
    tpu.vector_store %arg3[%c0_7, %c0_8], %21 {strides = array<i32>} : memref<1x128xf32, #tpu.memory_space<vmem>>, vector<1x128xf32>,
    return
  }
  func.func @transform_0(%arg0: i32) -> (i32, i32) {
    %c0_i32 = arith.constant 0 : i32
    %c0_i32_0 = arith.constant 0 : i32
    return %arg0, %c0_i32 : i32, i32
  }
  func.func @transform_1(%arg0: i32) -> (i32, i32) {
    %c0_i32 = arith.constant 0 : i32
    %c0_i32_0 = arith.constant 0 : i32
    return %arg0, %c0_i32 : i32, i32
  }
  func.func @transform_2(%arg0: i32) -> (i32, i32) {
    %c0_i32 = arith.constant 0 : i32
    %c0_i32_0 = arith.constant 0 : i32
    return %arg0, %c0_i32 : i32, i32
  }
}

</mosaic_0001>

<bundles_post_ra>
// kernel: tpu_custom_call.1
= control target key start
LH: loop header
LB: loop body
LE: loop exit
PB: predicated region body
PF: predicated region fallthrough
CT: control target
= control target key end

     0   :  { %7 = vsyncpa [#allocation3], 0  ;;  %s356_s0 = inlined_call_operand.hbm [shape: f32[16,128], index: 0, kind: input, shape index: {}]   ;;  %s357_s1 = inlined_call_operand.hbm [shape: f32[16,128], index: 1, kind: input, shape index: {}]   ;;  %s358_s2 = inlined_call_operand.hbm [shape: f32[1,128], index: 2, kind: output, shape index: {}]  }
   0x1   :  { %8 = vsyncpa [#allocation6], 0 }
   0x2   :  { %9 = vsyncpa [#allocation4], 0  ;;  %s14_s11 = sshll.u32 %s356_s0, 4  ;;  %s301_s12 = smov [#allocation2]   ;;  %s15_s11 = int_to_ptr.hbm [resolvable:$true] %s14_s11 }
   0x3   :  { %s16_s13 = sshll.u32 %s301_s12, 4  ;;  %s27_s16 = sshll.u32 %s357_s1, 4  ;;  %s17_s13 = int_to_ptr.vmem [resolvable:$true] %s16_s13  ;;  %s28_s16 = int_to_ptr.hbm [resolvable:$true] %s27_s16 }
   0x4   :  { %s302_s17 = smov 128   ;;  %s303_s18 = smov 8  }
   0x5   :  { %22 = dma.hbm_to_vmem [thread:$0]  %s15_s11, 256, %s17_s13, [#allocation3], %s302_s17, %s302_s17, %s303_s18  }
   0x6   :  { %s304_s19 = smov [#allocation5]  }
   0x7   :  { %s29_s20 = sshll.u32 %s304_s19, 4  ;;  %s30_s20 = int_to_ptr.vmem [resolvable:$true] %s29_s20 }
   0x8   :  { %35 = dma.hbm_to_vmem [thread:$0]  %s28_s16, 256, %s30_s20, [#allocation6], %s302_s17, %s302_s17, %s303_s18  }
   0x9   :  { %295 = dma.done.wait [#allocation3], 256  }
   0xa   :  { %296 = vsyncadd [#allocation3], 4294967040 }
   0xb   :  { %297 = dma.done.wait [#allocation6], 256  }
   0xc   :  { %298 = vsyncadd [#allocation6], 4294967040  ;;  %v327_v0 = vld [vmem:[#allocation5] sm:$0xff]  ;;  %v329_v1 = vld [vmem:[#allocation2] sm:$0xff]  ;;  %s305_s0 = smov [#allocation7]   ;;  %s191_s23 = sshll.u32 %s358_s2, 4  ;;  %s192_s23 = int_to_ptr.hbm [resolvable:$true] %s191_s23 }
   0xd   :  { %v110_v2 = vmul.f32 %v327_v0, %v327_v0  ;;  %v46_v3 = vmul.f32 %v329_v1, %v329_v1  ;;  %v335_v4 = vld [vmem:[#allocation5 + $0x8] sm:$0xff]  ;;  %v337_v5 = vld [vmem:[#allocation2 + $0x8] sm:$0xff]  ;;  %s189_s1 = sshll.u32 %s305_s0, 4  ;;  %s190_s1 = int_to_ptr.vmem [resolvable:$true] %s189_s1 }
   0xe   :  { %v111_v6 = vmul.f32 %v335_v4, %v335_v4  ;;  %v47_v7 = vmul.f32 %v337_v5, %v337_v5 }
   0xf   :  { %112 = vadd.xlane.f32.xlu1 %v110_v2  ;;  %48 = vadd.xlane.f32.xlu0 %v46_v3 }
  0x17   :  { %114 = vadd.xlane.f32.xlu1 %v111_v6  ;;  %50 = vadd.xlane.f32.xlu0 %v47_v7 }
  0x82   :  { %v113_v8 = vpop.xlane.xlu1 %112  ;;  %v49_v9 = vpop.xlane.xlu0 %48 }
  0x83   :  { %207 = vrsqrt.f32 %v113_v8  ;;  %vm123_vm0 = vcmp.eq.f32.partialorder %v113_v8, inf  ;;  %vm125_vm1 = vcmp.eq.f32.partialorder %v113_v8, 0.0  ;;  %v126_v30 = vand.u32 2147483648, %v113_v8 }
  0x84   :  { %209 = vrsqrt.f32 %v49_v9  ;;  %vm59_vm2 = vcmp.eq.f32.partialorder %v49_v9, inf  ;;  %v62_v34 = vand.u32 2147483648, %v49_v9  ;;  %vm61_vm3 = vcmp.eq.f32.partialorder %v49_v9, 0.0 }
  0x89   :  { %v208_v10 = vpop.eup %207 }
  0x8a   :  { %v210_v11 = vpop.eup %209  ;;  %v117_v12 = vmul.f32 %v208_v10, %v113_v8  ;;  %v115_v13 = vpop.xlane.xlu1 %114 }
  0x8b   :  { %v51_v14 = vpop.xlane.xlu0 %50  ;;  %v53_v15 = vmul.f32 %v210_v11, %v49_v9  ;;  %211 = vrsqrt.f32 %v115_v13  ;;  %vm135_vm4 = vcmp.eq.f32.partialorder %v115_v13, inf  ;;  %v138_v47 = vand.u32 2147483648, %v115_v13 }
  0x8c   :  { %v118_v16 = vmul.f32 %v208_v10, %v117_v12  ;;  %213 = vrsqrt.f32 %v51_v14  ;;  %vm137_vm5 = vcmp.eq.f32.partialorder %v115_v13, 0.0  ;;  %vm71_vm6 = vcmp.eq.f32.partialorder %v51_v14, inf }
  0x8d   :  { %v54_v17 = vmul.f32 %v210_v11, %v53_v15  ;;  %v74_v50 = vand.u32 2147483648, %v51_v14  ;;  %vm73_vm7 = vcmp.eq.f32.partialorder %v51_v14, 0.0 }
  0x8e   :  { %v119_v18 = vmul.f32 0.5, %v118_v16 }
  0x8f   :  { %v55_v19 = vmul.f32 0.5, %v54_v17 }
  0x90   :  { %v120_v20 = vsub.f32 1.5, %v119_v18 }
  0x91   :  { %v212_v21 = vpop.eup %211  ;;  %v56_v22 = vsub.f32 1.5, %v55_v19 }
  0x92   :  { %v214_v23 = vpop.eup %213  ;;  %v121_v24 = vmul.f32 %v208_v10, %v120_v20  ;;  %v129_v25 = vmul.f32 %v212_v21, %v115_v13 }
  0x93   :  { %v57_v26 = vmul.f32 %v210_v11, %v56_v22  ;;  %v65_v27 = vmul.f32 %v214_v23, %v51_v14 }
  0x94   :  { %v122_v28 = vmul.f32 %v121_v24, %v113_v8  ;;  %v130_v29 = vmul.f32 %v212_v21, %v129_v25 }
  0x95   :  { %v58_v31 = vmul.f32 %v57_v26, %v49_v9  ;;  %v66_v32 = vmul.f32 %v214_v23, %v65_v27 }
  0x96   :  { %v124_v33 = vsel %vm123_vm0, %v113_v8, %v122_v28  ;;  %v131_v35 = vmul.f32 0.5, %v130_v29 }
  0x97   :  { %v127_v36 = vsel %vm125_vm1, %v126_v30, %v124_v33  ;;  %v60_v37 = vsel %vm59_vm2, %v49_v9, %v58_v31  ;;  %v67_v38 = vmul.f32 0.5, %v66_v32 }
  0x98   :  { %v140_v39 = vmax.f32 %v127_v36, 1e-12  ;;  %v63_v40 = vsel %vm61_vm3, %v62_v34, %v60_v37  ;;  %v132_v41 = vsub.f32 1.5, %v131_v35 }
  0x99   :  { %v76_v42 = vmax.f32 %v63_v40, 1e-12  ;;  %v68_v43 = vsub.f32 1.5, %v67_v38 }
  0x9a   :  { %215 = vrcp.f32 %v140_v39  ;;  %v133_v44 = vmul.f32 %v212_v21, %v132_v41  ;;  %v151_v2 = vand.u32 2147483647, %v140_v39  ;;  %vm147_vm10 = vweird.f32 %v140_v39 }
  0x9b   :  { %217 = vrcp.f32 %v76_v42  ;;  %v69_v45 = vmul.f32 %v214_v23, %v68_v43  ;;  %v87_v3 = vand.u32 2147483647, %v76_v42  ;;  %v89_v6 = vand.u32 2147483648, %v76_v42 }
  0x9c   :  { %v134_v46 = vmul.f32 %v133_v44, %v115_v13  ;;  %v153_v7 = vand.u32 2147483648, %v140_v39  ;;  %vm83_vm11 = vweird.f32 %v76_v42  ;;  %vm152_vm14 = vcmp.eq.f32.partialorder %v151_v2, 8.507059e+37 }
  0x9d   :  { %v70_v48 = vmul.f32 %v69_v45, %v51_v14  ;;  %vm88_vm15 = vcmp.eq.f32.partialorder %v87_v3, 8.507059e+37  ;;  %v90_v18 = vor.u32 1.1754944e-38, %v89_v6 }
  0x9e   :  { %v136_v49 = vsel %vm135_vm4, %v115_v13, %v134_v46  ;;  %v154_v19 = vor.u32 1.1754944e-38, %v153_v7 }
  0x9f   :  { %v139_v51 = vsel %vm137_vm5, %v138_v47, %v136_v49  ;;  %v72_v52 = vsel %vm71_vm6, %v51_v14, %v70_v48 }
  0xa0   :  { %v216_v53 = vpop.eup %215  ;;  %v141_v54 = vmax.f32 %v139_v51, 1e-12  ;;  %v75_v55 = vsel %vm73_vm7, %v74_v50, %v72_v52 }
  0xa1   :  { %v218_v56 = vpop.eup %217  ;;  %v77_v57 = vmax.f32 %v75_v55, 1e-12  ;;  %v143_v58 = vmul.f32 %v216_v53, %v140_v39  ;;  %vm148_vm8 = vweird.f32 %v216_v53 }
  0xa2   :  { %219 = vrcp.f32 %v141_v54  ;;  %v79_v59 = vmul.f32 %v218_v56, %v76_v42  ;;  %vm84_vm9 = vweird.f32 %v218_v56  ;;  %vm343_vm12 = vmor %vm147_vm10, %vm148_vm8  ;;  %v166_v22 = vand.u32 2147483647, %v141_v54 }
  0xa3   :  { %221 = vrcp.f32 %v77_v57  ;;  %v144_v61 = vsub.f32 1.0, %v143_v58  ;;  %vm85_vm13 = vmor %vm83_vm11, %vm84_vm9  ;;  %v104_v21 = vand.u32 2147483648, %v77_v57  ;;  %v168_v23 = vand.u32 2147483648, %v141_v54 }
  0xa4   :  { %v80_v60 = vsub.f32 1.0, %v79_v59  ;;  %v102_v28 = vand.u32 2147483647, %v77_v57  ;;  %vm98_vm2 = vweird.f32 %v77_v57  ;;  %vm162_vm3 = vweird.f32 %v141_v54 }
  0xa5   :  { %v145_v63 = vmul.f32 %v216_v53, %v144_v61  ;;  %v169_v33 = vor.u32 1.1754944e-38, %v168_v23  ;;  %v105_v34 = vor.u32 1.1754944e-38, %v104_v21  ;;  %vm167_vm6 = vcmp.eq.f32.partialorder %v166_v22, 8.507059e+37 }
  0xa6   :  { %v81_v62 = vmul.f32 %v218_v56, %v80_v60  ;;  %vm103_vm7 = vcmp.eq.f32.partialorder %v102_v28, 8.507059e+37 }
  0xa7   :  { %v146_v10 = vadd.f32 %v216_v53, %v145_v63 }
  0xa8   :  { %v220_v8 = vpop.eup %219  ;;  %v82_v9 = vadd.f32 %v218_v56, %v81_v62 }
  0xa9   :  { %v222_v12 = vpop.eup %221  ;;  %v158_v13 = vmul.f32 %v220_v8, %v141_v54  ;;  %v150_v16 = vsel %vm343_vm12, %v216_v53, %v146_v10  ;;  %vm163_vm0 = vweird.f32 %v220_v8 }
  0xaa   :  { %v94_v14 = vmul.f32 %v222_v12, %v77_v57  ;;  %v86_v15 = vsel %vm85_vm13, %v218_v56, %v82_v9  ;;  %v155_v25 = vsel %vm152_vm14, %v154_v19, %v150_v16  ;;  %vm99_vm1 = vweird.f32 %v222_v12  ;;  %vm164_vm4 = vmor %vm162_vm3, %vm163_vm0 }
  0xab   :  { %v159_v17 = vsub.f32 1.0, %v158_v13  ;;  %v91_v24 = vsel %vm88_vm15, %v90_v18, %v86_v15  ;;  %v156_v32 = vmul.f32 %v155_v25, %v327_v0  ;;  %vm100_vm5 = vmor %vm98_vm2, %vm99_vm1 }
  0xac   :  { %v95_v20 = vsub.f32 1.0, %v94_v14  ;;  %v92_v30 = vmul.f32 %v91_v24, %v329_v1 }
  0xad   :  { %v160_v26 = vmul.f32 %v220_v8, %v159_v17 }
  0xae   :  { %v96_v27 = vmul.f32 %v222_v12, %v95_v20  ;;  %v172_v41 = vsub.f32 %v92_v30, %v156_v32 }
  0xaf   :  { %v161_v29 = vadd.f32 %v220_v8, %v160_v26 }
  0xb0   :  { %v97_v31 = vadd.f32 %v222_v12, %v96_v27  ;;  %v174_v1 = vmul.f32 %v172_v41, %v172_v41 }
  0xb1   :  { %v165_v35 = vsel %vm164_vm4, %v220_v8, %v161_v29 }
  0xb2   :  { %v101_v36 = vsel %vm100_vm5, %v222_v12, %v97_v31  ;;  %v170_v37 = vsel %vm167_vm6, %v169_v33, %v165_v35 }
  0xb3   :  { %v106_v38 = vsel %vm103_vm7, %v105_v34, %v101_v36  ;;  %v171_v39 = vmul.f32 %v170_v37, %v335_v4 }
  0xb4   :  { %v107_v40 = vmul.f32 %v106_v38, %v337_v5 }
  0xb6   :  { %v173_v42 = vsub.f32 %v107_v40, %v171_v39 }
  0xb8   :  { %v175_v43 = vmul.f32 %v173_v42, %v173_v42 }
  0xba   :  { %v176_v44 = vadd.f32 %v175_v43, %v174_v1 }
  0xbc   :  { %v177_v0 = vrot.slane %v176_v44, 4 }
  0xbe   :  { %v178_v45 = vadd.f32 %v177_v0, %v176_v44 }
  0xc0   :  { %v179_v46 = vrot.slane %v178_v45, 2 }
  0xc2   :  { %v180_v47 = vadd.f32 %v179_v46, %v178_v45 }
  0xc4   :  { %v181_v48 = vrot.slane %v180_v47, 1 }
  0xc6   :  { %v182_v49 = vadd.f32 %v181_v48, %v180_v47 }
  0xc8   :  { %183 = vst [vmem:[#allocation7] sm:$0x1] %v182_v49 }
  0xc9   :  { %194 = dma.vmem_to_hbm [thread:$0]  %s190_s1, 16, %s192_s23, [#allocation4]  }
  0xca   :  { %299 = dma.done.wait [#allocation4], 16  }
  0xcb   :  { %300 = vsyncadd [#allocation4], 4294967280 }
  0xcc   :  { %199 = vsyncpa [#allocation3], 1 }
  0xcd   :  { %200 = vsyncpa [#allocation6], 1 }
  0xce   :  { %201 = vsyncpa [#allocation4], 1 }

</bundles_post_ra>
